<compile_context>
chip_gen: v5e
topology: v5e:2x2
jax: 0.10.0
libtpu: 0.0.40
codegen_flags: <defaults>
</compile_context>

<pallas_src>
import jax
import jax.numpy as jnp
from jax import lax
from jax.experimental import pallas as pl
from jax.experimental.pallas import tpu as pltpu

HIDDEN_SIZE = 32


def _round_up(x, m):
    return ((x + m - 1) // m) * m


def _critic_kernel(s_ref, a_ref, w1s_ref, w1a_ref, b1_ref,
                   w2_ref, b2_ref, w3_ref, b3_ref, o_ref):
    # s_ref: (TB, input_dim), a_ref: (TB, action_dim) -- native row-major blocks.
    # Contract the feature axis of both operands (a @ b.T / transpose_rhs):
    # (H, feat) x (TB, feat) -> (H, TB).  The result lands directly in the
    # transposed, lane-dense (batch-on-lanes) layout with no HBM-side transpose.
    dn = (((1,), (1,)), ((), ()))
    z1 = (lax.dot_general(w1s_ref[...], s_ref[...], dn,
                          preferred_element_type=jnp.float32)
          + lax.dot_general(w1a_ref[...], a_ref[...], dn,
                            preferred_element_type=jnp.float32)
          + b1_ref[...])
    h1 = jnp.tanh(z1)                                            # (H, TB) f32

    h2 = jnp.tanh(jnp.dot(w2_ref[...], h1,
                          preferred_element_type=jnp.float32)
                  + b2_ref[...])                                 # (H, TB) f32

    # q1: 1-wide projection as VPU multiply + cross-sublane reduce (skip a
    # 1-row MXU pass); output block stays lane-dense (1, TB).
    o_ref[...] = jnp.sum(w3_ref[...] * h2, axis=0, keepdims=True) + b3_ref[...]


def _pick_batch_tile(B, block_b):
    """Batch tile: multiple of 128 (unless B<=128), sized so the grid has a
    handful of blocks -- amortizes per-step overhead, keeps both v7x cores
    busy, and leaves the double-buffer pipeline something to overlap."""
    if B <= 128:
        return B                       # single block whose shape == full dims
    floor128 = (B // 128) * 128        # keep TB <= B (standard partial last block)
    if block_b is not None:
        tb = _round_up(block_b, 128)
    else:
        tb = max(_round_up(pl.cdiv(B, 8), 128), 512)   # aim for ~8 blocks
        tb = min(tb, 4096)                             # VMEM-safe on all gens
    return max(128, min(tb, floor128))


def critic_forward(state, action, params, *, block_b=None, compute_dtype=None):
    """Pallas-backed forward pass of Critic.

    state:  (B, input_dim)  float32
    action: (B, action_dim) float32
    params: PyTorch-layout (out, in) weights / (out,) biases, float32.
    block_b: optional batch-tile override (rounded up to a multiple of 128).
    compute_dtype: optionally jnp.bfloat16 -> the MXU reads bf16 activations /
        fc1 weights (halves activation HBM+VMEM traffic on v6e/v7x);
        accumulation, biases, tanh and the output stay f32.
    returns (B, 1) float32
    """
    w1, b1, w2, b2, w3, b3 = params
    B, input_dim = state.shape
    action_dim = action.shape[1]
    H = HIDDEN_SIZE
    feat = input_dim + action_dim

    if compute_dtype is not None:
        state = state.astype(compute_dtype)
        action = action.astype(compute_dtype)
        w1 = w1.astype(compute_dtype)

    TB = _pick_batch_tile(B, block_b)
    n_blocks = pl.cdiv(B, TB)          # partial last block handled by Pallas

    # Trace-time (free) weight plumbing: split fc1 over [state | action]; make
    # biases / q1 weight columns so they broadcast along the lane (batch) axis.
    w1s = w1[:, :input_dim]                         # (H, input_dim)
    w1a = w1[:, input_dim:]                         # (H, action_dim)
    b1c = b1.reshape(H, 1).astype(jnp.float32)
    w2f = w2.astype(jnp.float32)
    b2c = b2.reshape(H, 1).astype(jnp.float32)
    w3c = w3.reshape(H, 1).astype(jnp.float32)      # (1, H) -> column for reduce
    b3c = b3.reshape(1, 1).astype(jnp.float32)

    def pinned(shape):
        # Same block every grid step -> fetched once, stays VMEM-resident.
        return pl.BlockSpec(shape, lambda i: (0, 0))

    act_bytes = jnp.dtype(state.dtype).itemsize
    cost = pl.CostEstimate(
        flops=2 * B * (feat * H + H * H + H),
        transcendentals=2 * B * H,
        bytes_accessed=(act_bytes * B * feat + 4 * B
                        + 4 * (feat * H + H * H + 3 * H + 1)),
    )

    out = pl.pallas_call(
        _critic_kernel,
        out_shape=jax.ShapeDtypeStruct((1, B), jnp.float32),
        grid=(n_blocks,),
        in_specs=[
            pl.BlockSpec((TB, input_dim), lambda i: (i, 0)),    # state rows
            pl.BlockSpec((TB, action_dim), lambda i: (i, 0)),   # action rows
            pinned((H, input_dim)),    # w1 (state part)
            pinned((H, action_dim)),   # w1 (action part)
            pinned((H, 1)),            # b1
            pinned((H, H)),            # w2
            pinned((H, 1)),            # b2
            pinned((H, 1)),            # w3 (column)
            pinned((1, 1)),            # b3
        ],
        out_specs=pl.BlockSpec((1, TB), lambda i: (0, i)),
        compiler_params=pltpu.CompilerParams(
            dimension_semantics=("parallel",),
            vmem_limit_bytes=32 * 1024 * 1024,
        ),
        cost_estimate=cost,
    )(state, action, w1s, w1a, b1c, w2f, b2c, w3c, b3c)

    return out.reshape(B, 1)


def init_critic_params(key, input_dim, action_dim):
    """PyTorch nn.Linear-style init: uniform(+/- 1/sqrt(fan_in)), (out, in) weights."""
    def linear(k, fan_in, fan_out):
        kw, kb = jax.random.split(k)
        bound = 1.0 / jnp.sqrt(jnp.float32(fan_in))
        w = jax.random.uniform(kw, (fan_out, fan_in), jnp.float32, -bound, bound)
        b = jax.random.uniform(kb, (fan_out,), jnp.float32, -bound, bound)
        return w, b

    k1, k2, k3 = jax.random.split(key, 3)
    w1, b1 = linear(k1, input_dim + action_dim, HIDDEN_SIZE)
    w2, b2 = linear(k2, HIDDEN_SIZE, HIDDEN_SIZE)
    w3, b3 = linear(k3, HIDDEN_SIZE, 1)
    return (w1, b1, w2, b2, w3, b3)


def critic_reference(state, action, params):
    """Plain-JAX reference (PyTorch semantics) for correctness checking."""
    w1, b1, w2, b2, w3, b3 = params
    x = jnp.concatenate([state, action], axis=-1)
    h1 = jnp.tanh(x @ w1.T + b1)
    h2 = jnp.tanh(h1 @ w2.T + b2)
    return h2 @ w3.T + b3


if __name__ == "__main__":
    key = jax.random.PRNGKey(0)
    k_params, k_s1, k_a1, k_s2, k_a2 = jax.random.split(key, 5)

    input_dim, action_dim = 12, 4
    params = init_critic_params(k_params, input_dim, action_dim)

    # Small batch: single full-shape block (no tiling edge cases).
    batch = 8
    s1 = jax.random.normal(k_s1, (batch, input_dim), jnp.float32)
    a1 = jax.random.normal(k_a1, (batch, action_dim), jnp.float32)
    q = jax.block_until_ready(critic_forward(s1, a1, params))
    q_ref = critic_reference(s1, a1, params)
    assert q.shape == (batch, 1)
    assert jnp.allclose(q, q_ref, atol=1e-5, rtol=1e-5)

    # Non-divisible batch with a multi-step grid and a partial last block
    # (exercises padding-free OOB handling + pipelining).
    batch2 = 300
    s2 = jax.random.normal(k_s2, (batch2, input_dim), jnp.float32)
    a2 = jax.random.normal(k_a2, (batch2, action_dim), jnp.float32)
    q2 = jax.block_until_ready(critic_forward(s2, a2, params, block_b=128))
    q2_ref = critic_reference(s2, a2, params)
    assert q2.shape == (batch2, 1)
    assert jnp.allclose(q2, q2_ref, atol=1e-5, rtol=1e-5)

    # Optional bf16 activation-read path (perf knob for v6e/v7x); loose check.
    q2_bf16 = jax.block_until_ready(
        critic_forward(s2, a2, params, compute_dtype=jnp.bfloat16))
    assert q2_bf16.shape == (batch2, 1)
    assert jnp.allclose(q2_bf16, q2_ref, atol=1e-1)

    print("KERNEL_OK")
</pallas_src>

<mosaic_0001>
module attributes {stable_mosaic.version = 11 : i64} {
  func.func @_critic_kernel(%arg0: i32, %arg1: memref<8x12xf32, #tpu.memory_space<vmem>>, %arg2: memref<8x4xf32, #tpu.memory_space<vmem>>, %arg3: memref<32x12xf32, #tpu.memory_space<vmem>>, %arg4: memref<32x4xf32, #tpu.memory_space<vmem>>, %arg5: memref<32x1xf32, #tpu.memory_space<vmem>>, %arg6: memref<32x32xf32, #tpu.memory_space<vmem>>, %arg7: memref<32x1xf32, #tpu.memory_space<vmem>>, %arg8: memref<32x1xf32, #tpu.memory_space<vmem>>, %arg9: memref<1x1xf32, #tpu.memory_space<vmem>>, %arg10: memref<1x8xf32, #tpu.memory_space<vmem>>) attributes {dimension_semantics = [#tpu.dimension_semantics<parallel>], iteration_bounds = array<i64: 1>, scalar_prefetch = 0 : i64, scratch_operands = 0 : i64, tpu.core_type = #tpu.core_type<tc>, window_params = [{transform_indices = @transform_0, window_bounds = array<i64: 8, 12>}, {transform_indices = @transform_1, window_bounds = array<i64: 8, 4>}, {pipeline_mode = #tpu.pipeline_mode<synchronous>, transform_indices = @transform_2, window_bounds = array<i64: 32, 12>}, {pipeline_mode = #tpu.pipeline_mode<synchronous>, transform_indices = @transform_3, window_bounds = array<i64: 32, 4>}, {pipeline_mode = #tpu.pipeline_mode<synchronous>, transform_indices = @transform_4, window_bounds = array<i64: 32, 1>}, {pipeline_mode = #tpu.pipeline_mode<synchronous>, transform_indices = @transform_5, window_bounds = array<i64: 32, 32>}, {pipeline_mode = #tpu.pipeline_mode<synchronous>, transform_indices = @transform_6, window_bounds = array<i64: 32, 1>}, {pipeline_mode = #tpu.pipeline_mode<synchronous>, transform_indices = @transform_7, window_bounds = array<i64: 32, 1>}, {pipeline_mode = #tpu.pipeline_mode<synchronous>, transform_indices = @transform_8, window_bounds = array<i64: 1, 1>}, {transform_indices = @transform_9, window_bounds = array<i64: 1, 8>}]} {
    %c0 = arith.constant 0 : index
    %c0_0 = arith.constant 0 : index
    %0 = vector.load %arg3[%c0, %c0_0] : memref<32x12xf32, #tpu.memory_space<vmem>>, vector<32x12xf32>
    %c0_1 = arith.constant 0 : index
    %c0_2 = arith.constant 0 : index
    %1 = vector.load %arg1[%c0_1, %c0_2] : memref<8x12xf32, #tpu.memory_space<vmem>>, vector<8x12xf32>
    %cst = arith.constant dense<0.000000e+00> : vector<32x8xf32>
    %2 = tpu.matmul %0, %1, %cst {dimension_numbers = #tpu.dot_dimension_numbers<[1], [1], [0], [0], [0, 0, 1, 0], [], []>} : vector<32x12xf32>, vector<8x12xf32>, vector<32x8xf32> -> vector<32x8xf32>
    %c0_3 = arith.constant 0 : index
    %c0_4 = arith.constant 0 : index
    %3 = vector.load %arg4[%c0_3, %c0_4] : memref<32x4xf32, #tpu.memory_space<vmem>>, vector<32x4xf32>
    %c0_5 = arith.constant 0 : index
    %c0_6 = arith.constant 0 : index
    %4 = vector.load %arg2[%c0_5, %c0_6] : memref<8x4xf32, #tpu.memory_space<vmem>>, vector<8x4xf32>
    %cst_7 = arith.constant dense<0.000000e+00> : vector<32x8xf32>
    %5 = tpu.matmul %3, %4, %cst_7 {dimension_numbers = #tpu.dot_dimension_numbers<[1], [1], [0], [0], [0, 0, 1, 0], [], []>} : vector<32x4xf32>, vector<8x4xf32>, vector<32x8xf32> -> vector<32x8xf32>
    %6 = arith.addf %2, %5 : vector<32x8xf32>
    %c0_8 = arith.constant 0 : index
    %c0_9 = arith.constant 0 : index
    %7 = vector.load %arg5[%c0_8, %c0_9] : memref<32x1xf32, #tpu.memory_space<vmem>>, vector<32x1xf32>
    %8 = vector.broadcast %7 : vector<32x1xf32> to vector<32x8xf32>
    %9 = arith.addf %6, %8 : vector<32x8xf32>
    %10 = math.tanh %9 : vector<32x8xf32>
    %c0_10 = arith.constant 0 : index
    %c0_11 = arith.constant 0 : index
    %11 = vector.load %arg6[%c0_10, %c0_11] : memref<32x32xf32, #tpu.memory_space<vmem>>, vector<32x32xf32>
    %cst_12 = arith.constant dense<0.000000e+00> : vector<32x8xf32>
    %12 = tpu.matmul %11, %10, %cst_12 {dimension_numbers = #tpu.dot_dimension_numbers<[1], [0], [0], [1], [0, 0, 1, 1], [], []>} : vector<32x32xf32>, vector<32x8xf32>, vector<32x8xf32> -> vector<32x8xf32>
    %c0_13 = arith.constant 0 : index
    %c0_14 = arith.constant 0 : index
    %13 = vector.load %arg7[%c0_13, %c0_14] : memref<32x1xf32, #tpu.memory_space<vmem>>, vector<32x1xf32>
    %14 = vector.broadcast %13 : vector<32x1xf32> to vector<32x8xf32>
    %15 = arith.addf %12, %14 : vector<32x8xf32>
    %16 = math.tanh %15 : vector<32x8xf32>
    %c0_15 = arith.constant 0 : index
    %c0_16 = arith.constant 0 : index
    %17 = vector.load %arg8[%c0_15, %c0_16] : memref<32x1xf32, #tpu.memory_space<vmem>>, vector<32x1xf32>
    %18 = vector.broadcast %17 : vector<32x1xf32> to vector<32x8xf32>
    %19 = arith.mulf %18, %16 : vector<32x8xf32>
    %cst_17 = arith.constant dense<0.000000e+00> : vector<8xf32>
    %20 = vector.multi_reduction <add>, %19, %cst_17 [0] : vector<32x8xf32> to vector<8xf32>
    %21 = vector.shape_cast %20 : vector<8xf32> to vector<1x8xf32>
    %c0_18 = arith.constant 0 : index
    %c0_19 = arith.constant 0 : index
    %22 = vector.load %arg9[%c0_18, %c0_19] : memref<1x1xf32, #tpu.memory_space<vmem>>, vector<1x1xf32>
    %23 = vector.broadcast %22 : vector<1x1xf32> to vector<1x8xf32>
    %24 = arith.addf %21, %23 : vector<1x8xf32>
    %c0_20 = arith.constant 0 : index
    %c0_21 = arith.constant 0 : index
    %25 = vector.load %arg10[%c0_20, %c0_21] : memref<1x8xf32, #tpu.memory_space<vmem>>, vector<1x8xf32>
    tpu.vector_store %arg10[%c0_20, %c0_21], %24 {strides = array<i32>} : memref<1x8xf32, #tpu.memory_space<vmem>>, vector<1x8xf32>,
    return
  }
  func.func @transform_0(%arg0: i32) -> (i32, i32) {
    %c0_i32 = arith.constant 0 : i32
    %c0_i32_0 = arith.constant 0 : i32
    return %arg0, %c0_i32 : i32, i32
  }
  func.func @transform_1(%arg0: i32) -> (i32, i32) {
    %c0_i32 = arith.constant 0 : i32
    %c0_i32_0 = arith.constant 0 : i32
    return %arg0, %c0_i32 : i32, i32
  }
  func.func @transform_2(%arg0: i32) -> (i32, i32) {
    %c0_i32 = arith.constant 0 : i32
    %c0_i32_0 = arith.constant 0 : i32
    %c0_i32_1 = arith.constant 0 : i32
    return %c0_i32, %c0_i32_0 : i32, i32
  }
  func.func @transform_3(%arg0: i32) -> (i32, i32) {
    %c0_i32 = arith.constant 0 : i32
    %c0_i32_0 = arith.constant 0 : i32
    %c0_i32_1 = arith.constant 0 : i32
    return %c0_i32, %c0_i32_0 : i32, i32
  }
  func.func @transform_4(%arg0: i32) -> (i32, i32) {
    %c0_i32 = arith.constant 0 : i32
    %c0_i32_0 = arith.constant 0 : i32
    %c0_i32_1 = arith.constant 0 : i32
    return %c0_i32, %c0_i32_0 : i32, i32
  }
  func.func @transform_5(%arg0: i32) -> (i32, i32) {
    %c0_i32 = arith.constant 0 : i32
    %c0_i32_0 = arith.constant 0 : i32
    %c0_i32_1 = arith.constant 0 : i32
    return %c0_i32, %c0_i32_0 : i32, i32
  }
  func.func @transform_6(%arg0: i32) -> (i32, i32) {
    %c0_i32 = arith.constant 0 : i32
    %c0_i32_0 = arith.constant 0 : i32
    %c0_i32_1 = arith.constant 0 : i32
    return %c0_i32, %c0_i32_0 : i32, i32
  }
  func.func @transform_7(%arg0: i32) -> (i32, i32) {
    %c0_i32 = arith.constant 0 : i32
    %c0_i32_0 = arith.constant 0 : i32
    %c0_i32_1 = arith.constant 0 : i32
    return %c0_i32, %c0_i32_0 : i32, i32
  }
  func.func @transform_8(%arg0: i32) -> (i32, i32) {
    %c0_i32 = arith.constant 0 : i32
    %c0_i32_0 = arith.constant 0 : i32
    %c0_i32_1 = arith.constant 0 : i32
    return %c0_i32, %c0_i32_0 : i32, i32
  }
  func.func @transform_9(%arg0: i32) -> (i32, i32) {
    %c0_i32 = arith.constant 0 : i32
    %c0_i32_0 = arith.constant 0 : i32
    return %c0_i32, %arg0 : i32, i32
  }
}

</mosaic_0001>

<bundles_post_ra>
// kernel: tpu_custom_call.1
= control target key start
LH: loop header
LB: loop body
LE: loop exit
PB: predicated region body
PF: predicated region fallthrough
CT: control target
= control target key end

     0   :  { %s520_s0 = inlined_call_operand.vmem [shape: f32[8,12], index: 0, kind: input, shape index: {}]   ;;  %s521_s1 = inlined_call_operand.vmem [shape: f32[8,4], index: 1, kind: input, shape index: {}]   ;;  %s522_s2 = inlined_call_operand.vmem [shape: f32[32,12], index: 2, kind: input, shape index: {}]   ;;  %s523_s3 = inlined_call_operand.vmem [shape: f32[32,4], index: 3, kind: input, shape index: {}]   ;;  %s524_s4 = inlined_call_operand.vmem [shape: f32[32,1], index: 4, kind: input, shape index: {}]   ;;  %s525_s5 = inlined_call_operand.vmem [shape: f32[32,32], index: 5, kind: input, shape index: {}]   ;;  %s526_s6 = inlined_call_operand.vmem [shape: f32[32,1], index: 6, kind: input, shape index: {}]   ;;  %s527_s7 = inlined_call_operand.vmem [shape: f32[32,1], index: 7, kind: input, shape index: {}]   ;;  %s528_s8 = inlined_call_operand.<no memory space> [shape: f32[1,1], index: 8, kind: input, shape index: {}]   ;;  %s529_s9 = inlined_call_operand.hbm [shape: f32[1,8], index: 9, kind: output, shape index: {}]  }
   0x1   :  { %v14_v0 = vstv %s528_s8 }
   0x2   :  { %15 = vst [vmem:[#allocation2] sm:$0x1] %v14_v0 }
   0x3   :  { %v44_v1 = vld [vmem:[%s521_s1] sm:$0xff]  ;;  %vm45_vm0 = vcmask 31744   ;;  %vm90_vm1 = vcmask 97280   ;;  %v138_v3 = vld [vmem:[%s524_s4 + $0x18] sm:$0xff]  ;;  %v136_v6 = vld [vmem:[%s524_s4 + $0x8] sm:$0xff]  ;;  %v374_v7 = vmov 0  }
   0x4   :  { %v39_v2 = vld [vmem:[%s520_s0] sm:$0xff]  ;;  %309 = vmatpush.xpose.msk.msra.mxu0 %vm45_vm0, %v44_v1  ;;  %329 = vset.pattern.permute.xlu0 %v374_v7 }
   0x5   :  { %314 = vmatpush.xpose.msk.msra.mxu1 %vm90_vm1, %v39_v2  ;;  %v40_v4 = vld [vmem:[%s523_s3] sm:$0xff]  ;;  %330 = vset.pattern.permute.xlu1 %v374_v7 }
   0x6   :  { %v35_v5 = vld [vmem:[%s522_s2] sm:$0xff]  ;;  %156 = vperm.xlu0 %329, %v138_v3   ;;  %146 = vperm.xlu1 %330, %v136_v6  }
   0x7   :  { %310 = vmatmul.msk.f32.vlgmr.msra.gmra.mxu0 %vm45_vm0, %v40_v4  ;;  %331 = vset.pattern.permute.xlu2 %v374_v7 }
   0x8   :  { %315 = vmatmul.msk.f32.vlgmr.msra.gmra.mxu1 %vm90_vm1, %v35_v5 }
   0x9   :  { %16 = vsyncpa [#allocation4], 0  ;;  %v137_v8 = vld [vmem:[%s524_s4 + $0x10] sm:$0xff]  ;;  %v135_v9 = vld [vmem:[%s524_s4] sm:$0xff]  ;;  %vm195_vm2 = vcmask 261120   ;;  %vm269_vm3 = vcmask 64512  }
   0xa   :  { %v41_v10 = vld [vmem:[%s523_s3 + $0x8] sm:$0xff]  ;;  %v173_v12 = vld [vmem:[%s526_s6 + $0x10] sm:$0xff]  ;;  %v174_v13 = vld [vmem:[%s526_s6 + $0x18] sm:$0xff]  ;;  %s300_s12 = sshll.u32 %s529_s9, 4  ;;  %vm291_vm4 = vcmask 57344   ;;  %s301_s12 = int_to_ptr.hbm [resolvable:$true] %s300_s12 }
   0xb   :  { %v36_v11 = vld [vmem:[%s522_s2 + $0x8] sm:$0xff]  ;;  %v42_v14 = vld [vmem:[%s523_s3 + $0x10] sm:$0xff]  ;;  %v43_v18 = vld [vmem:[%s523_s3 + $0x18] sm:$0xff] }
   0xc   :  { %v37_v15 = vld [vmem:[%s522_s2 + $0x10] sm:$0xff]  ;;  %v242_v16 = vld [vmem:[%s527_s7 + $0x8] sm:$0xff]  ;;  %v38_v19 = vld [vmem:[%s522_s2 + $0x18] sm:$0xff] }
   0xd   :  { %v243_v17 = vld [vmem:[%s527_s7 + $0x10] sm:$0xff]  ;;  %v283_v20 = vld [vmem:[#allocation2] sm:$0x1]  ;;  %v172_v42 = vld [vmem:[%s526_s6 + $0x8] sm:$0xff] }
   0xe   :  { %151 = vperm.xlu0 %329, %v137_v8   ;;  %141 = vperm.xlu1 %330, %v135_v9   ;;  %v171_v38 = vld [vmem:[%s526_s6] sm:$0xff]  ;;  %v168_v47 = vld [vmem:[%s525_s5 + $0x8] sm:$0xff]  ;;  %v169_v50 = vld [vmem:[%s525_s5 + $0x10] sm:$0xff] }
   0xf   :  { %311 = vmatmul.msk.f32.gmra.mxu0 %vm45_vm0, %v41_v10  ;;  %177 = vperm.xlu2 %331, %v171_v38   ;;  %v167_v46 = vld [vmem:[%s525_s5] sm:$0xff]  ;;  %v244_v51 = vld [vmem:[%s527_s7 + $0x18] sm:$0xff] }
  0x10   :  { %316 = vmatmul.msk.f32.gmra.mxu1 %vm90_vm1, %v36_v11  ;;  %v241_v49 = vld [vmem:[%s527_s7] sm:$0xff]  ;;  %v170_v52 = vld [vmem:[%s525_s5 + $0x18] sm:$0xff]  ;;  %s375_s5 = smov [#allocation3]  }
  0x11   :  { %s298_s7 = sshll.u32 %s375_s5, 4  ;;  %s299_s7 = int_to_ptr.vmem [resolvable:$true] %s298_s7 }
  0x16   :  { %187 = vperm.xlu0 %329, %v173_v12   ;;  %192 = vperm.xlu1 %330, %v174_v13  }
  0x17   :  { %312 = vmatmul.msk.f32.gmra.mxu0 %vm45_vm0, %v42_v14  ;;  %182 = vperm.xlu2 %331, %v172_v42  }
  0x18   :  { %317 = vmatmul.msk.f32.gmra.mxu1 %vm90_vm1, %v37_v15 }
  0x1e   :  { %252 = vperm.xlu0 %329, %v242_v16   ;;  %257 = vperm.xlu1 %330, %v243_v17  }
  0x1f   :  { %313 = vmatmul.msk.f32.gmra.mxu0 %vm45_vm0, %v43_v18  ;;  %247 = vperm.xlu2 %331, %v241_v49  }
  0x20   :  { %318 = vmatmul.msk.f32.gmra.mxu1 %vm90_vm1, %v38_v19 }
  0x26   :  { %286 = vperm.xlu0 %329, %v283_v20  }
  0x27   :  { %262 = vperm.xlu2 %331, %v244_v51  }
  0x69   :  { %v178_v53 = vpop.permute.xlu2 %177 }
  0x71   :  { %v183_v56 = vpop.permute.xlu2 %182 }
  0x78   :  { %v157_v25 = vpop.permute.xlu0 %156  ;;  %v147_v28 = vpop.permute.xlu1 %146 }
  0x79   :  { %v248_v1 = vpop.permute.xlu2 %247 }
  0x80   :  { %v152_v34 = vpop.permute.xlu0 %151  ;;  %v142_v39 = vpop.permute.xlu1 %141 }
  0x81   :  { %v263_v15 = vpop.permute.xlu2 %262 }
  0x84   :  { %v78_v21 = vpop.f32.mrf.mxu0 }
  0x85   :  { %v123_v22 = vpop.f32.mrf.mxu1 }
  0x86   :  { %v124_v35 = vadd.f32 %v123_v22, %v78_v21 }
  0x88   :  { %v159_v41 = vadd.f32 %v142_v39, %v124_v35  ;;  %v188_v59 = vpop.permute.xlu0 %187  ;;  %v193_v61 = vpop.permute.xlu1 %192 }
  0x8c   :  { %v81_v23 = vpop.f32.mrf.mxu0 }
  0x8d   :  { %v126_v24 = vpop.f32.mrf.mxu1 }
  0x8e   :  { %v127_v32 = vadd.f32 %v126_v24, %v81_v23 }
  0x90   :  { %v160_v40 = vadd.f32 %v147_v28, %v127_v32  ;;  %v253_v4 = vpop.permute.xlu0 %252  ;;  %v258_v8 = vpop.permute.xlu1 %257 }
  0x94   :  { %v84_v26 = vpop.f32.mrf.mxu0 }
  0x95   :  { %v129_v27 = vpop.f32.mrf.mxu1 }
  0x96   :  { %v130_v29 = vadd.f32 %v129_v27, %v84_v26 }
  0x98   :  { %v161_v36 = vadd.f32 %v152_v34, %v130_v29  ;;  %v287_v24 = vpop.permute.xlu0 %286 }
  0x99   :  { %v289_v26 = vperm.slane %v287_v24, 0 }
  0x9c   :  { %v87_v30 = vpop.f32.mrf.mxu0 }
  0x9d   :  { %v132_v31 = vpop.f32.mrf.mxu1 }
  0x9e   :  { %v133_v33 = vadd.f32 %v132_v31, %v87_v30 }
  0xa0   :  { %v162_v37 = vadd.f32 %v157_v25, %v133_v33 }
  0xa2   :  { %332 = vtanh.f32 %v162_v37 }
  0xa3   :  { %334 = vtanh.f32 %v161_v36 }
  0xa4   :  { %336 = vtanh.f32 %v160_v40 }
  0xa5   :  { %338 = vtanh.f32 %v159_v41 }
  0xa8   :  { %v333_v43 = vpop.eup %332 }
  0xa9   :  { %220 = vmatpush.msra.mxu2 %v333_v43  ;;  %323 = vmatpush.msra.mxu3 %v333_v43  ;;  %v335_v44 = vpop.eup %334 }
  0xaa   :  { %v337_v45 = vpop.eup %336 }
  0xab   :  { %221 = vmatpush.msra.mxu2 %v335_v44  ;;  %324 = vmatpush.msra.mxu3 %v335_v44  ;;  %v339_v48 = vpop.eup %338 }
  0xad   :  { %222 = vmatpush.msra.mxu2 %v337_v45  ;;  %325 = vmatpush.msra.mxu3 %v337_v45 }
  0xaf   :  { %223 = vmatpush.msra.mxu2 %v339_v48  ;;  %326 = vmatpush.msra.mxu3 %v339_v48 }
  0xb0   :  { %319 = vmatmul.msk.f32.vlgmr.msra.gmra.mxu2 %vm195_vm2, %v167_v46  ;;  %320 = vmatmul.msk.f32.vlgmr.msra.gmra.mxu3 %vm195_vm2, %v168_v47 }
  0xb8   :  { %321 = vmatmul.msk.f32.gmra.mxu3 %vm195_vm2, %v169_v50 }
  0xc0   :  { %322 = vmatmul.msk.f32.gmra.mxu3 %vm195_vm2, %v170_v52 }
 0x133   :  { %v228_v54 = vpop.f32.mrf.mxu3  ;;  %v225_v55 = vpop.f32.mrf.mxu2 }
 0x134   :  { %v226_v57 = vadd.f32 %v225_v55, %v178_v53  ;;  %v229_v58 = vadd.f32 %v228_v54, %v183_v56 }
 0x136   :  { %340 = vtanh.f32 %v226_v57 }
 0x137   :  { %342 = vtanh.f32 %v229_v58 }
 0x13b   :  { %v231_v60 = vpop.f32.mrf.mxu3 }
 0x13c   :  { %v232_v62 = vadd.f32 %v231_v60, %v188_v59  ;;  %v341_v63 = vpop.eup %340 }
 0x13d   :  { %v343_v0 = vpop.eup %342  ;;  %v265_v6 = vmul.f32 %v341_v63, %v248_v1 }
 0x13e   :  { %344 = vtanh.f32 %v232_v62  ;;  %v266_v7 = vmul.f32 %v343_v0, %v253_v4 }
 0x13f   :  { %v270_v10 = vsel %vm269_vm3, %v265_v6, 0.0 }
 0x140   :  { %v271_v11 = vsel %vm269_vm3, %v266_v7, 0.0 }
 0x141   :  { %v272_v14 = vadd.f32 %v271_v11, %v270_v10 }
 0x143   :  { %v234_v2 = vpop.f32.mrf.mxu3 }
 0x144   :  { %v345_v3 = vpop.eup %344  ;;  %v235_v5 = vadd.f32 %v234_v2, %v193_v61 }
 0x145   :  { %v267_v9 = vmul.f32 %v345_v3, %v258_v8 }
 0x146   :  { %346 = vtanh.f32 %v235_v5 }
 0x147   :  { %v273_v12 = vsel %vm269_vm3, %v267_v9, 0.0 }
 0x148   :  { %v274_v17 = vadd.f32 %v273_v12, %v272_v14 }
 0x14c   :  { %v347_v13 = vpop.eup %346 }
 0x14d   :  { %v268_v16 = vmul.f32 %v347_v13, %v263_v15 }
 0x14f   :  { %v275_v18 = vsel %vm269_vm3, %v268_v16, 0.0 }
 0x150   :  { %v276_v19 = vadd.f32 %v275_v18, %v274_v17 }
 0x152   :  { %v277_v20 = vrot.slane %v276_v19, 4 }
 0x154   :  { %v278_v21 = vadd.f32 %v277_v20, %v276_v19 }
 0x156   :  { %v279_v22 = vrot.slane %v278_v21, 2 }
 0x158   :  { %v280_v23 = vadd.f32 %v279_v22, %v278_v21 }
 0x15a   :  { %v281_v25 = vrot.slane %v280_v23, 1 }
 0x15c   :  { %v282_v27 = vadd.f32 %v281_v25, %v280_v23 }
 0x15e   :  { %v290_v28 = vadd.f32 %v289_v26, %v282_v27 }
 0x160   :  { %292 = vst.msk [vmem:[#allocation3] sm:$0x1] %vm291_vm4, %v290_v28 }
 0x161   :  { %303 = dma.vmem_to_hbm [thread:$0]  %s299_s7, 16, %s301_s12, [#allocation4]  }
 0x162   :  { %372 = dma.done.wait [#allocation4], 16  }
 0x163   :  { %373 = vsyncadd [#allocation4], 4294967280 }
 0x164   :  { %308 = vsyncpa [#allocation4], 1 }

</bundles_post_ra>
